<compile_context>
chip_gen: v5e
topology: v5e:2x2
jax: 0.10.0
libtpu: 0.0.40
codegen_flags: <defaults>
</compile_context>

<pallas_src>
import functools
from typing import Any, NamedTuple

import jax
import jax.numpy as jnp
from jax.experimental import pallas as pl
from jax.experimental.pallas import tpu as pltpu

_LANE = 128      # lane width (last-dim granularity)
_SUBLANE = 8     # sublane granularity for 32-bit rows


def _round_up(x, m):
    return ((x + m - 1) // m) * m


def _pad_feature_dim(d, compute_dtype, mxu_256_align):
    mult = _LANE
    if mxu_256_align and jnp.dtype(compute_dtype).itemsize < 4 and d > _LANE:
        # v6e/v7x bf16 MXU tiles are 256x256; odd multiples of 128 run half-filled.
        mult = 256
    return _round_up(d, mult)


def _pick_batch_tiling(batch, max_tile, row_align):
    """Pick (batch_tile, padded_batch): aligned rows, bounded padding waste,
    and >=2 grid steps whenever possible (v7x has 2 TensorCores)."""
    b_min = _round_up(batch, row_align)
    max_tile = max(row_align, (min(max_tile, b_min) // row_align) * row_align)
    waste_budget = max(row_align, b_min // 8)        # allow <= ~12.5% padding
    best_key, best = None, None
    for tb in range(max_tile, 0, -row_align):
        b_pad = _round_up(b_min, tb)
        waste = b_pad - b_min
        steps = b_pad // tb
        key = (waste > waste_budget,    # 1) stay within the padding budget
               steps < 2,               # 2) prefer >=2 grid steps (megacore)
               -tb)                     # 3) then the biggest tile (fewest steps)
        if best_key is None or key < best_key:
            best_key, best = key, (tb, b_pad)
    return best


# ---------------------------------------------------------------------------
# Kernel
# ---------------------------------------------------------------------------

def _fused_mlp_kernel(x_ref, *refs, nlayers):
    """One batch tile through the whole layer stack; the activation never
    leaves the core (vregs / VMEM).

    refs = (W0..W_{n-1}, b0..b_{n-1}, o_ref).  Weights are (nin_pad, nout_pad)
    in the compute dtype; biases are (1, nout_pad) f32.  Accumulation is f32.
    """
    w_refs = refs[:nlayers]
    b_refs = refs[nlayers:2 * nlayers]
    o_ref = refs[2 * nlayers]

    y = x_ref[...]
    for il in range(nlayers):
        if il > 0:
            # ReLU on the previous layer's f32 accumulator (module applies ReLU
            # *before* the Linear for every layer except the first).
            y = jnp.maximum(y, 0.0)
        w = w_refs[il][...]
        y = jnp.dot(y.astype(w.dtype), w, preferred_element_type=jnp.float32)
        y = y + b_refs[il][...]            # (1, nout_pad) f32, broadcasts over rows
    o_ref[...] = y.astype(o_ref.dtype)


# ---------------------------------------------------------------------------
# One-time parameter preparation (hoisted off the forward hot path)
# ---------------------------------------------------------------------------

class PreparedMLP(NamedTuple):
    w_pads: tuple          # nlayers x (nin_pad, nout_pad) arrays, compute dtype
    b_pads: tuple          # nlayers x (1, nout_pad) arrays, float32
    dims: tuple            # true feature dims (ninp, nhid, ..., nout)
    pdims: tuple           # padded feature dims
    compute_dtype: Any     # numpy dtype


def prepare_params(params, *, compute_dtype=jnp.bfloat16, mxu_256_align=True):
    """Cast to the compute dtype and zero-pad to MXU-friendly shapes, ONCE."""
    compute_dtype = jnp.dtype(compute_dtype)
    dims = tuple([params[0][0].shape[0]] + [w.shape[1] for (w, _) in params])
    pdims = tuple(_pad_feature_dim(d, compute_dtype, mxu_256_align) for d in dims)
    w_pads, b_pads = [], []
    for il, (w, b) in enumerate(params):
        wp = (jnp.zeros((pdims[il], pdims[il + 1]), compute_dtype)
              .at[: w.shape[0], : w.shape[1]].set(w.astype(compute_dtype)))
        # Bias stays f32 (added to the f32 accumulator; negligible bytes).
        bp = (jnp.zeros((1, pdims[il + 1]), jnp.float32)
              .at[0, : b.shape[0]].set(b.astype(jnp.float32)))
        w_pads.append(wp)
        b_pads.append(bp)
    return PreparedMLP(tuple(w_pads), tuple(b_pads), dims, pdims, compute_dtype)


# ---------------------------------------------------------------------------
# pallas_call construction
# ---------------------------------------------------------------------------

def _build_call(prep, true_batch, tb, b_pad, out_dtype, single_buffer_resident):
    nlayers = len(prep.w_pads)
    pdims, dims = prep.pdims, prep.dims
    c_item = prep.compute_dtype.itemsize
    o_item = jnp.dtype(out_dtype).itemsize

    resident_kwargs = {}
    if single_buffer_resident:
        # Weights / biases are grid-invariant: one pipeline buffer is enough.
        resident_kwargs["pipeline_mode"] = pl.Buffered(1)

    in_specs = [pl.BlockSpec((tb, pdims[0]), lambda i: (i, 0))]
    for il in range(nlayers):
        in_specs.append(pl.BlockSpec((pdims[il], pdims[il + 1]),
                                     lambda i: (0, 0), **resident_kwargs))
    for il in range(nlayers):
        in_specs.append(pl.BlockSpec((1, pdims[il + 1]),
                                     lambda i: (0, 0), **resident_kwargs))
    out_spec = pl.BlockSpec((tb, pdims[-1]), lambda i: (i, 0))

    # --- explicit VMEM budget -------------------------------------------------
    resident_bytes = (sum(w.size * w.dtype.itemsize for w in prep.w_pads)
                      + sum(b.size * b.dtype.itemsize for b in prep.b_pads))
    resident_bufs = 1 if single_buffer_resident else 2
    io_bytes = 2 * (tb * pdims[0] * c_item + tb * pdims[-1] * o_item)  # dbl-buffered
    act_bytes = tb * max(pdims) * 4                                    # f32 inter-layer
    need = resident_bufs * resident_bytes + io_bytes + act_bytes
    # 2x headroom + 4 MiB; floor 32 MiB; cap 60 MiB so it is legal on v7x (64 MiB
    # physical) as well as v5e/v6e (raise the cap toward ~100 MiB there if needed).
    vmem_limit = int(min(max(2 * need + (4 << 20), 32 << 20), 60 << 20))

    # --- advisory cost estimate with TRUE (unpadded) flops / bytes -------------
    flops = sum(2 * true_batch * dims[il] * dims[il + 1] for il in range(nlayers))
    bytes_accessed = (true_batch * dims[0] * c_item
                      + sum(dims[il] * dims[il + 1] * c_item for il in range(nlayers))
                      + sum(dims[il + 1] * 4 for il in range(nlayers))
                      + true_batch * dims[-1] * o_item)

    kernel = functools.partial(_fused_mlp_kernel, nlayers=nlayers)
    return pl.pallas_call(
        kernel,
        out_shape=jax.ShapeDtypeStruct((b_pad, pdims[-1]), out_dtype),
        grid=(b_pad // tb,),
        in_specs=in_specs,
        out_specs=out_spec,
        compiler_params=pltpu.CompilerParams(
            dimension_semantics=("parallel",),   # batch tiles shard across TCs
            vmem_limit_bytes=vmem_limit),
        cost_estimate=pl.CostEstimate(
            flops=flops, transcendentals=0, bytes_accessed=bytes_accessed),
    )


_SINGLE_BUFFER_RESIDENT_OK = None   # tri-state, probed lazily on first call


def mlp_forward(x, prep, *, batch_tile=512):
    """Fused forward pass.  x: (B, ninp); prep: PreparedMLP from prepare_params()."""
    global _SINGLE_BUFFER_RESIDENT_OK
    B, ninp = x.shape
    assert ninp == prep.dims[0], (ninp, prep.dims[0])

    cdt = prep.compute_dtype
    # bf16 packs 2 rows per sublane (fp8: 4) -> batch-tile row alignment.
    row_align = _SUBLANE * max(1, 4 // cdt.itemsize)
    tb, b_pad = _pick_batch_tiling(B, batch_tile, row_align)

    # Zero-pad the activation (exact: padded rows/cols are zero, sliced off below).
    xp = jnp.zeros((b_pad, prep.pdims[0]), cdt).at[:B, :ninp].set(x.astype(cdt))
    out_dtype = x.dtype
    args = (xp, *prep.w_pads, *prep.b_pads)

    if _SINGLE_BUFFER_RESIDENT_OK is not False:
        try:
            out_padded = _build_call(prep, B, tb, b_pad, out_dtype, True)(*args)
            _SINGLE_BUFFER_RESIDENT_OK = True
        except Exception:
            # pl.Buffered(1) not supported by this Pallas build -> double-buffered.
            _SINGLE_BUFFER_RESIDENT_OK = False
    if _SINGLE_BUFFER_RESIDENT_OK is False:
        out_padded = _build_call(prep, B, tb, b_pad, out_dtype, False)(*args)

    return out_padded[:B, : prep.dims[-1]]


# ---------------------------------------------------------------------------
# Parameter init (matches nn.Linear shapes) and pure-JAX reference
# ---------------------------------------------------------------------------

def init_mlp_params(key, ninp, nhid, nout, nlayers):
    """nn.Linear(nin_l, nout_l) has weight (nout_l, nin_l), bias (nout_l,);
    we store the weight already transposed to (nin_l, nout_l), in f32 (master)."""
    params = []
    for il in range(nlayers):
        nin_l = ninp if il == 0 else nhid
        nout_l = nout if il == nlayers - 1 else nhid
        key, kw, kb = jax.random.split(key, 3)
        bound = 1.0 / jnp.sqrt(jnp.asarray(nin_l, jnp.float32))
        w_t = jax.random.uniform(kw, (nin_l, nout_l), jnp.float32, -bound, bound)
        b = jax.random.uniform(kb, (nout_l,), jnp.float32, -bound, bound)
        params.append((w_t, b))
    return params


def mlp_reference(x, params):
    y = x
    for il, (w_t, b) in enumerate(params):
        if il > 0:
            y = jnp.maximum(y, 0.0)
        y = y @ w_t + b
    return y


if __name__ == "__main__":
    # Small shapes consistent with the module: MLP(ninp=32, nhid=64, nout=16, nlayers=3)
    B, NINP, NHID, NOUT, NLAYERS = 8, 32, 64, 16, 3

    key = jax.random.PRNGKey(0)
    key, kx = jax.random.split(key)
    x = jax.random.normal(kx, (B, NINP), jnp.float32)
    params = init_mlp_params(key, NINP, NHID, NOUT, NLAYERS)
    ref = mlp_reference(x, params)

    # f32 compute path: tight tolerance check.
    prep_f32 = prepare_params(params, compute_dtype=jnp.float32)
    out_f32 = jax.block_until_ready(mlp_forward(x, prep_f32))
    assert out_f32.shape == (B, NOUT), out_f32.shape
    assert jnp.allclose(out_f32, ref, atol=1e-4, rtol=1e-4), "f32 mismatch vs reference"

    # bf16 compute path (production config: native MXU rate), loosened tolerance.
    prep_bf16 = prepare_params(params, compute_dtype=jnp.bfloat16)
    out_bf16 = jax.block_until_ready(mlp_forward(x, prep_bf16))
    assert out_bf16.shape == (B, NOUT), out_bf16.shape
    assert jnp.allclose(out_bf16, ref, atol=2e-2, rtol=2e-2), "bf16 mismatch vs reference"

    print("KERNEL_OK")
</pallas_src>

<mosaic_0001>
module attributes {stable_mosaic.version = 11 : i64} {
  func.func @_fused_mlp_kernel(%arg0: i32, %arg1: memref<8x128xf32, #tpu.memory_space<vmem>>, %arg2: memref<128x128xf32, #tpu.memory_space<vmem>>, %arg3: memref<128x128xf32, #tpu.memory_space<vmem>>, %arg4: memref<128x128xf32, #tpu.memory_space<vmem>>, %arg5: memref<1x128xf32, #tpu.memory_space<vmem>>, %arg6: memref<1x128xf32, #tpu.memory_space<vmem>>, %arg7: memref<1x128xf32, #tpu.memory_space<vmem>>, %arg8: memref<8x128xf32, #tpu.memory_space<vmem>>) attributes {dimension_semantics = [#tpu.dimension_semantics<parallel>], iteration_bounds = array<i64: 1>, scalar_prefetch = 0 : i64, scratch_operands = 0 : i64, tpu.core_type = #tpu.core_type<tc>, window_params = [{transform_indices = @transform_0, window_bounds = array<i64: 8, 128>}, {pipeline_mode = #tpu.pipeline_mode<synchronous>, transform_indices = @transform_1, window_bounds = array<i64: 128, 128>}, {pipeline_mode = #tpu.pipeline_mode<synchronous>, transform_indices = @transform_2, window_bounds = array<i64: 128, 128>}, {pipeline_mode = #tpu.pipeline_mode<synchronous>, transform_indices = @transform_3, window_bounds = array<i64: 128, 128>}, {pipeline_mode = #tpu.pipeline_mode<synchronous>, transform_indices = @transform_4, window_bounds = array<i64: 1, 128>}, {pipeline_mode = #tpu.pipeline_mode<synchronous>, transform_indices = @transform_5, window_bounds = array<i64: 1, 128>}, {pipeline_mode = #tpu.pipeline_mode<synchronous>, transform_indices = @transform_6, window_bounds = array<i64: 1, 128>}, {transform_indices = @transform_7, window_bounds = array<i64: 8, 128>}]} {
    %c0 = arith.constant 0 : index
    %c0_0 = arith.constant 0 : index
    %0 = vector.load %arg1[%c0, %c0_0] : memref<8x128xf32, #tpu.memory_space<vmem>>, vector<8x128xf32>
    %c0_1 = arith.constant 0 : index
    %c0_2 = arith.constant 0 : index
    %1 = vector.load %arg2[%c0_1, %c0_2] : memref<128x128xf32, #tpu.memory_space<vmem>>, vector<128x128xf32>
    %cst = arith.constant dense<0.000000e+00> : vector<8x128xf32>
    %2 = tpu.matmul %0, %1, %cst {dimension_numbers = #tpu.dot_dimension_numbers<[1], [0], [0], [1], [0, 0, 1, 1], [], []>} : vector<8x128xf32>, vector<128x128xf32>, vector<8x128xf32> -> vector<8x128xf32>
    %c0_3 = arith.constant 0 : index
    %c0_4 = arith.constant 0 : index
    %3 = vector.load %arg5[%c0_3, %c0_4] : memref<1x128xf32, #tpu.memory_space<vmem>>, vector<1x128xf32>
    %4 = vector.broadcast %3 : vector<1x128xf32> to vector<8x128xf32>
    %5 = arith.addf %2, %4 : vector<8x128xf32>
    %cst_5 = arith.constant 0.000000e+00 : f32
    %6 = vector.broadcast %cst_5 : f32 to vector<8x128xf32>
    %7 = arith.maximumf %5, %6 : vector<8x128xf32>
    %c0_6 = arith.constant 0 : index
    %c0_7 = arith.constant 0 : index
    %8 = vector.load %arg3[%c0_6, %c0_7] : memref<128x128xf32, #tpu.memory_space<vmem>>, vector<128x128xf32>
    %cst_8 = arith.constant dense<0.000000e+00> : vector<8x128xf32>
    %9 = tpu.matmul %7, %8, %cst_8 {dimension_numbers = #tpu.dot_dimension_numbers<[1], [0], [0], [1], [0, 0, 1, 1], [], []>} : vector<8x128xf32>, vector<128x128xf32>, vector<8x128xf32> -> vector<8x128xf32>
    %c0_9 = arith.constant 0 : index
    %c0_10 = arith.constant 0 : index
    %10 = vector.load %arg6[%c0_9, %c0_10] : memref<1x128xf32, #tpu.memory_space<vmem>>, vector<1x128xf32>
    %11 = vector.broadcast %10 : vector<1x128xf32> to vector<8x128xf32>
    %12 = arith.addf %9, %11 : vector<8x128xf32>
    %cst_11 = arith.constant 0.000000e+00 : f32
    %13 = vector.broadcast %cst_11 : f32 to vector<8x128xf32>
    %14 = arith.maximumf %12, %13 : vector<8x128xf32>
    %c0_12 = arith.constant 0 : index
    %c0_13 = arith.constant 0 : index
    %15 = vector.load %arg4[%c0_12, %c0_13] : memref<128x128xf32, #tpu.memory_space<vmem>>, vector<128x128xf32>
    %cst_14 = arith.constant dense<0.000000e+00> : vector<8x128xf32>
    %16 = tpu.matmul %14, %15, %cst_14 {dimension_numbers = #tpu.dot_dimension_numbers<[1], [0], [0], [1], [0, 0, 1, 1], [], []>} : vector<8x128xf32>, vector<128x128xf32>, vector<8x128xf32> -> vector<8x128xf32>
    %c0_15 = arith.constant 0 : index
    %c0_16 = arith.constant 0 : index
    %17 = vector.load %arg7[%c0_15, %c0_16] : memref<1x128xf32, #tpu.memory_space<vmem>>, vector<1x128xf32>
    %18 = vector.broadcast %17 : vector<1x128xf32> to vector<8x128xf32>
    %19 = arith.addf %16, %18 : vector<8x128xf32>
    %c0_17 = arith.constant 0 : index
    %c0_18 = arith.constant 0 : index
    %20 = vector.load %arg8[%c0_17, %c0_18] : memref<8x128xf32, #tpu.memory_space<vmem>>, vector<8x128xf32>
    tpu.vector_store %arg8[%c0_17, %c0_18], %19 {strides = array<i32>} : memref<8x128xf32, #tpu.memory_space<vmem>>, vector<8x128xf32>,
    return
  }
  func.func @transform_0(%arg0: i32) -> (i32, i32) {
    %c0_i32 = arith.constant 0 : i32
    %c0_i32_0 = arith.constant 0 : i32
    return %arg0, %c0_i32 : i32, i32
  }
  func.func @transform_1(%arg0: i32) -> (i32, i32) {
    %c0_i32 = arith.constant 0 : i32
    %c0_i32_0 = arith.constant 0 : i32
    %c0_i32_1 = arith.constant 0 : i32
    return %c0_i32, %c0_i32_0 : i32, i32
  }
  func.func @transform_2(%arg0: i32) -> (i32, i32) {
    %c0_i32 = arith.constant 0 : i32
    %c0_i32_0 = arith.constant 0 : i32
    %c0_i32_1 = arith.constant 0 : i32
    return %c0_i32, %c0_i32_0 : i32, i32
  }
  func.func @transform_3(%arg0: i32) -> (i32, i32) {
    %c0_i32 = arith.constant 0 : i32
    %c0_i32_0 = arith.constant 0 : i32
    %c0_i32_1 = arith.constant 0 : i32
    return %c0_i32, %c0_i32_0 : i32, i32
  }
  func.func @transform_4(%arg0: i32) -> (i32, i32) {
    %c0_i32 = arith.constant 0 : i32
    %c0_i32_0 = arith.constant 0 : i32
    %c0_i32_1 = arith.constant 0 : i32
    return %c0_i32, %c0_i32_0 : i32, i32
  }
  func.func @transform_5(%arg0: i32) -> (i32, i32) {
    %c0_i32 = arith.constant 0 : i32
    %c0_i32_0 = arith.constant 0 : i32
    %c0_i32_1 = arith.constant 0 : i32
    return %c0_i32, %c0_i32_0 : i32, i32
  }
  func.func @transform_6(%arg0: i32) -> (i32, i32) {
    %c0_i32 = arith.constant 0 : i32
    %c0_i32_0 = arith.constant 0 : i32
    %c0_i32_1 = arith.constant 0 : i32
    return %c0_i32, %c0_i32_0 : i32, i32
  }
  func.func @transform_7(%arg0: i32) -> (i32, i32) {
    %c0_i32 = arith.constant 0 : i32
    %c0_i32_0 = arith.constant 0 : i32
    return %arg0, %c0_i32 : i32, i32
  }
}

module attributes {stable_mosaic.version = 11 : i64} {
  func.func @_fused_mlp_kernel(%arg0: i32, %arg1: memref<8x128xf32, #tpu.memory_space<vmem>>, %arg2: memref<128x128xf32, #tpu.memory_space<vmem>>, %arg3: memref<128x128xf32, #tpu.memory_space<vmem>>, %arg4: memref<128x128xf32, #tpu.memory_space<vmem>>, %arg5: memref<1x128xf32, #tpu.memory_space<vmem>>, %arg6: memref<1x128xf32, #tpu.memory_space<vmem>>, %arg7: memref<1x128xf32, #tpu.memory_space<vmem>>, %arg8: memref<8x128xf32, #tpu.memory_space<vmem>>) attributes {dimension_semantics = [#tpu.dimension_semantics<parallel>], iteration_bounds = array<i64: 1>, scalar_prefetch = 0 : i64, scratch_operands = 0 : i64, tpu.core_type = #tpu.core_type<tc>, window_params = [{transform_indices = @transform_0, window_bounds = array<i64: 8, 128>}, {pipeline_mode = #tpu.pipeline_mode<synchronous>, transform_indices = @transform_1, window_bounds = array<i64: 128, 128>}, {pipeline_mode = #tpu.pipeline_mode<synchronous>, transform_indices = @transform_2, window_bounds = array<i64: 128, 128>}, {pipeline_mode = #tpu.pipeline_mode<synchronous>, transform_indices = @transform_3, window_bounds = array<i64: 128, 128>}, {pipeline_mode = #tpu.pipeline_mode<synchronous>, transform_indices = @transform_4, window_bounds = array<i64: 1, 128>}, {pipeline_mode = #tpu.pipeline_mode<synchronous>, transform_indices = @transform_5, window_bounds = array<i64: 1, 128>}, {pipeline_mode = #tpu.pipeline_mode<synchronous>, transform_indices = @transform_6, window_bounds = array<i64: 1, 128>}, {transform_indices = @transform_7, window_bounds = array<i64: 8, 128>}]} {
    %c0 = arith.constant 0 : index
    %c0_0 = arith.constant 0 : index
    %0 = vector.load %arg1[%c0, %c0_0] : memref<8x128xf32, #tpu.memory_space<vmem>>, vector<8x128xf32>
    %c0_1 = arith.constant 0 : index
    %c0_2 = arith.constant 0 : index
    %1 = vector.load %arg2[%c0_1, %c0_2] : memref<128x128xf32, #tpu.memory_space<vmem>>, vector<128x128xf32>
    %cst = arith.constant dense<0.000000e+00> : vector<8x128xf32>
    %2 = tpu.matmul %0, %1, %cst {dimension_numbers = #tpu.dot_dimension_numbers<[1], [0], [0], [1], [0, 0, 1, 1], [], []>} : vector<8x128xf32>, vector<128x128xf32>, vector<8x128xf32> -> vector<8x128xf32>
    %c0_3 = arith.constant 0 : index
    %c0_4 = arith.constant 0 : index
    %3 = vector.load %arg5[%c0_3, %c0_4] : memref<1x128xf32, #tpu.memory_space<vmem>>, vector<1x128xf32>
    %4 = vector.broadcast %3 : vector<1x128xf32> to vector<8x128xf32>
    %5 = arith.addf %2, %4 : vector<8x128xf32>
    %cst_5 = arith.constant 0.000000e+00 : f32
    %6 = vector.broadcast %cst_5 : f32 to vector<8x128xf32>
    %7 = arith.maximumf %5, %6 : vector<8x128xf32>
    %c0_6 = arith.constant 0 : index
    %c0_7 = arith.constant 0 : index
    %8 = vector.load %arg3[%c0_6, %c0_7] : memref<128x128xf32, #tpu.memory_space<vmem>>, vector<128x128xf32>
    %cst_8 = arith.constant dense<0.000000e+00> : vector<8x128xf32>
    %9 = tpu.matmul %7, %8, %cst_8 {dimension_numbers = #tpu.dot_dimension_numbers<[1], [0], [0], [1], [0, 0, 1, 1], [], []>} : vector<8x128xf32>, vector<128x128xf32>, vector<8x128xf32> -> vector<8x128xf32>
    %c0_9 = arith.constant 0 : index
    %c0_10 = arith.constant 0 : index
    %10 = vector.load %arg6[%c0_9, %c0_10] : memref<1x128xf32, #tpu.memory_space<vmem>>, vector<1x128xf32>
    %11 = vector.broadcast %10 : vector<1x128xf32> to vector<8x128xf32>
    %12 = arith.addf %9, %11 : vector<8x128xf32>
    %cst_11 = arith.constant 0.000000e+00 : f32
    %13 = vector.broadcast %cst_11 : f32 to vector<8x128xf32>
    %14 = arith.maximumf %12, %13 : vector<8x128xf32>
    %c0_12 = arith.constant 0 : index
    %c0_13 = arith.constant 0 : index
    %15 = vector.load %arg4[%c0_12, %c0_13] : memref<128x128xf32, #tpu.memory_space<vmem>>, vector<128x128xf32>
    %cst_14 = arith.constant dense<0.000000e+00> : vector<8x128xf32>
    %16 = tpu.matmul %14, %15, %cst_14 {dimension_numbers = #tpu.dot_dimension_numbers<[1], [0], [0], [1], [0, 0, 1, 1], [], []>} : vector<8x128xf32>, vector<128x128xf32>, vector<8x128xf32> -> vector<8x128xf32>
    %c0_15 = arith.constant 0 : index
    %c0_16 = arith.constant 0 : index
    %17 = vector.load %arg7[%c0_15, %c0_16] : memref<1x128xf32, #tpu.memory_space<vmem>>, vector<1x128xf32>
    %18 = vector.broadcast %17 : vector<1x128xf32> to vector<8x128xf32>
    %19 = arith.addf %16, %18 : vector<8x128xf32>
    %c0_17 = arith.constant 0 : index
    %c0_18 = arith.constant 0 : index
    %20 = vector.load %arg8[%c0_17, %c0_18] : memref<8x128xf32, #tpu.memory_space<vmem>>, vector<8x128xf32>
    tpu.vector_store %arg8[%c0_17, %c0_18], %19 {strides = array<i32>} : memref<8x128xf32, #tpu.memory_space<vmem>>, vector<8x128xf32>,
    return
  }
  func.func @transform_0(%arg0: i32) -> (i32, i32) {
    %c0_i32 = arith.constant 0 : i32
    %c0_i32_0 = arith.constant 0 : i32
    return %arg0, %c0_i32 : i32, i32
  }
  func.func @transform_1(%arg0: i32) -> (i32, i32) {
    %c0_i32 = arith.constant 0 : i32
    %c0_i32_0 = arith.constant 0 : i32
    %c0_i32_1 = arith.constant 0 : i32
    return %c0_i32, %c0_i32_0 : i32, i32
  }
  func.func @transform_2(%arg0: i32) -> (i32, i32) {
    %c0_i32 = arith.constant 0 : i32
    %c0_i32_0 = arith.constant 0 : i32
    %c0_i32_1 = arith.constant 0 : i32
    return %c0_i32, %c0_i32_0 : i32, i32
  }
  func.func @transform_3(%arg0: i32) -> (i32, i32) {
    %c0_i32 = arith.constant 0 : i32
    %c0_i32_0 = arith.constant 0 : i32
    %c0_i32_1 = arith.constant 0 : i32
    return %c0_i32, %c0_i32_0 : i32, i32
  }
  func.func @transform_4(%arg0: i32) -> (i32, i32) {
    %c0_i32 = arith.constant 0 : i32
    %c0_i32_0 = arith.constant 0 : i32
    %c0_i32_1 = arith.constant 0 : i32
    return %c0_i32, %c0_i32_0 : i32, i32
  }
  func.func @transform_5(%arg0: i32) -> (i32, i32) {
    %c0_i32 = arith.constant 0 : i32
    %c0_i32_0 = arith.constant 0 : i32
    %c0_i32_1 = arith.constant 0 : i32
    return %c0_i32, %c0_i32_0 : i32, i32
  }
  func.func @transform_6(%arg0: i32) -> (i32, i32) {
    %c0_i32 = arith.constant 0 : i32
    %c0_i32_0 = arith.constant 0 : i32
    %c0_i32_1 = arith.constant 0 : i32
    return %c0_i32, %c0_i32_0 : i32, i32
  }
  func.func @transform_7(%arg0: i32) -> (i32, i32) {
    %c0_i32 = arith.constant 0 : i32
    %c0_i32_0 = arith.constant 0 : i32
    return %arg0, %c0_i32 : i32, i32
  }
}

</mosaic_0001>

<bundles_post_ra>
// kernel: tpu_custom_call.1
= control target key start
LH: loop header
LB: loop body
LE: loop exit
PB: predicated region body
PF: predicated region fallthrough
CT: control target
= control target key end

     0   :  { %12 = vsyncpa [#allocation3], 0  ;;  %s440_s0 = inlined_call_operand.hbm [shape: f32[8,128], index: 0, kind: input, shape index: {}]   ;;  %s441_s1 = inlined_call_operand.hbm [shape: f32[128,128], index: 1, kind: input, shape index: {}]   ;;  %s442_s2 = inlined_call_operand.hbm [shape: f32[128,128], index: 2, kind: input, shape index: {}]   ;;  %s443_s3 = inlined_call_operand.hbm [shape: f32[128,128], index: 3, kind: input, shape index: {}]   ;;  %s444_s4 = inlined_call_operand.vmem [shape: f32[1,128], index: 4, kind: input, shape index: {}]   ;;  %s445_s5 = inlined_call_operand.vmem [shape: f32[1,128], index: 5, kind: input, shape index: {}]   ;;  %s446_s6 = inlined_call_operand.vmem [shape: f32[1,128], index: 6, kind: input, shape index: {}]   ;;  %s447_s7 = inlined_call_operand.hbm [shape: f32[8,128], index: 7, kind: output, shape index: {}]  }
   0x1   :  { %13 = vsyncpa [#allocation6], 0 }
   0x2   :  { %14 = vsyncpa [#allocation9], 0  ;;  %s31_s26 = sshll.u32 %s441_s1, 4  ;;  %s32_s26 = int_to_ptr.hbm [resolvable:$true] %s31_s26 }
   0x3   :  { %15 = vsyncpa [#allocation4], 0  ;;  %s369_s27 = smov [#allocation5]   ;;  %s21_s8 = sshll.u32 %s440_s0, 4  ;;  %s22_s8 = int_to_ptr.hbm [resolvable:$true] %s21_s8 }
   0x4   :  { %s33_s28 = sshll.u32 %s369_s27, 4  ;;  %s370_s9 = smov 128   ;;  %s34_s28 = int_to_ptr.vmem [resolvable:$true] %s33_s28 }
   0x5   :  { %s371_s10 = smov 8   ;;  %s372_s11 = smov [#allocation2]  }
   0x6   :  { %39 = dma.hbm_to_vmem [thread:$0]  %s32_s26, 2048, %s34_s28, [#allocation6], %s370_s9, %s370_s9, %s371_s10  }
   0x7   :  { %s23_s12 = sshll.u32 %s372_s11, 4  ;;  %s44_s15 = sshll.u32 %s442_s2, 4  ;;  %s24_s12 = int_to_ptr.vmem [resolvable:$true] %s23_s12  ;;  %s45_s15 = int_to_ptr.hbm [resolvable:$true] %s44_s15 }
   0x8   :  { %26 = dma.hbm_to_vmem [thread:$0]  %s22_s8, 128, %s24_s12, [#allocation3]  }
   0x9   :  { %s57_s17 = sshll.u32 %s443_s3, 4  ;;  %s373_s18 = smov [#allocation7]   ;;  %s58_s17 = int_to_ptr.hbm [resolvable:$true] %s57_s17 }
   0xa   :  { %s46_s19 = sshll.u32 %s373_s18, 4  ;;  %s374_s0 = smov [#allocation8]   ;;  %s47_s19 = int_to_ptr.vmem [resolvable:$true] %s46_s19 }
   0xb   :  { %52 = dma.hbm_to_vmem [thread:$0]  %s45_s15, 2048, %s47_s19, [#allocation6], %s370_s9, %s370_s9, %s371_s10  }
   0xc   :  { %s59_s20 = sshll.u32 %s374_s0, 4  ;;  %s60_s20 = int_to_ptr.vmem [resolvable:$true] %s59_s20 }
   0xd   :  { %65 = dma.hbm_to_vmem [thread:$0]  %s58_s17, 2048, %s60_s20, [#allocation9], %s370_s9, %s370_s9, %s371_s10  }
   0xe   :  { %361 = dma.done.wait [#allocation3], 128  }
   0xf   :  { %362 = vsyncadd [#allocation3], 4294967168 }
  0x10   :  { %363 = dma.done.wait [#allocation6], 4096  }
  0x11   :  { %364 = vsyncadd [#allocation6], 4294963200 }
  0x12   :  { %365 = dma.done.wait [#allocation9], 2048  }
  0x13   :  { %366 = vsyncadd [#allocation9], 4294965248  ;;  %v104_v0 = vld [vmem:[#allocation5 + $0x78] sm:$0xff]  ;;  %v103_v1 = vld [vmem:[#allocation5 + $0x70] sm:$0xff]  ;;  %s375_s24 = smov [#allocation10]   ;;  %s219_s28 = sshll.u32 %s447_s7, 4  ;;  %s220_s28 = int_to_ptr.hbm [resolvable:$true] %s219_s28 }
  0x14   :  { %109 = vmatpush.msra.mxu0 %v104_v0  ;;  %v102_v2 = vld [vmem:[#allocation5 + $0x68] sm:$0xff]  ;;  %v101_v3 = vld [vmem:[#allocation5 + $0x60] sm:$0xff]  ;;  %v145_v4 = vld [vmem:[#allocation7 + $0x78] sm:$0xff]  ;;  %s217_s25 = sshll.u32 %s375_s24, 4  ;;  %s218_s25 = int_to_ptr.vmem [resolvable:$true] %s217_s25 }
  0x15   :  { %v100_v5 = vld [vmem:[#allocation5 + $0x58] sm:$0xff]  ;;  %150 = vmatpush.msra.mxu1 %v145_v4  ;;  %v144_v6 = vld [vmem:[#allocation7 + $0x70] sm:$0xff]  ;;  %v143_v7 = vld [vmem:[#allocation7 + $0x68] sm:$0xff] }
  0x16   :  { %110 = vmatpush.msra.mxu0 %v103_v1  ;;  %v99_v8 = vld [vmem:[#allocation5 + $0x50] sm:$0xff]  ;;  %v142_v9 = vld [vmem:[#allocation7 + $0x60] sm:$0xff]  ;;  %v98_v10 = vld [vmem:[#allocation5 + $0x48] sm:$0xff] }
  0x17   :  { %151 = vmatpush.msra.mxu1 %v144_v6  ;;  %v141_v11 = vld [vmem:[#allocation7 + $0x58] sm:$0xff]  ;;  %v97_v12 = vld [vmem:[#allocation5 + $0x40] sm:$0xff]  ;;  %v140_v13 = vld [vmem:[#allocation7 + $0x50] sm:$0xff] }
  0x18   :  { %111 = vmatpush.msra.mxu0 %v102_v2  ;;  %v96_v14 = vld [vmem:[#allocation5 + $0x38] sm:$0xff]  ;;  %v139_v15 = vld [vmem:[#allocation7 + $0x48] sm:$0xff]  ;;  %v95_v16 = vld [vmem:[#allocation5 + $0x30] sm:$0xff] }
  0x19   :  { %152 = vmatpush.msra.mxu1 %v143_v7  ;;  %v138_v17 = vld [vmem:[#allocation7 + $0x40] sm:$0xff]  ;;  %v94_v18 = vld [vmem:[#allocation5 + $0x28] sm:$0xff]  ;;  %v137_v19 = vld [vmem:[#allocation7 + $0x38] sm:$0xff] }
  0x1a   :  { %112 = vmatpush.msra.mxu0 %v101_v3  ;;  %v93_v20 = vld [vmem:[#allocation5 + $0x20] sm:$0xff]  ;;  %v136_v21 = vld [vmem:[#allocation7 + $0x30] sm:$0xff]  ;;  %v92_v22 = vld [vmem:[#allocation5 + $0x18] sm:$0xff] }
  0x1b   :  { %153 = vmatpush.msra.mxu1 %v142_v9  ;;  %v135_v23 = vld [vmem:[#allocation7 + $0x28] sm:$0xff]  ;;  %v91_v24 = vld [vmem:[#allocation5 + $0x10] sm:$0xff]  ;;  %v134_v25 = vld [vmem:[#allocation7 + $0x20] sm:$0xff] }
  0x1c   :  { %113 = vmatpush.msra.mxu0 %v100_v5  ;;  %v90_v26 = vld [vmem:[#allocation5 + $0x8] sm:$0xff]  ;;  %v133_v27 = vld [vmem:[#allocation7 + $0x18] sm:$0xff]  ;;  %v89_v28 = vld [vmem:[#allocation5] sm:$0xff] }
  0x1d   :  { %154 = vmatpush.msra.mxu1 %v141_v11  ;;  %v88_v29 = vld [vmem:[#allocation2] sm:$0xff]  ;;  %v132_v30 = vld [vmem:[#allocation7 + $0x10] sm:$0xff]  ;;  %v131_v31 = vld [vmem:[#allocation7 + $0x8] sm:$0xff] }
  0x1e   :  { %114 = vmatpush.msra.mxu0 %v99_v8  ;;  %v130_v32 = vld [vmem:[#allocation7] sm:$0xff]  ;;  %v186_v33 = vld [vmem:[#allocation8 + $0x78] sm:$0xff]  ;;  %v185_v34 = vld [vmem:[#allocation8 + $0x70] sm:$0xff] }
  0x1f   :  { %155 = vmatpush.msra.mxu1 %v140_v13  ;;  %191 = vmatpush.msra.mxu2 %v186_v33  ;;  %v184_v35 = vld [vmem:[#allocation8 + $0x68] sm:$0xff]  ;;  %v183_v36 = vld [vmem:[#allocation8 + $0x60] sm:$0xff]  ;;  %v182_v37 = vld [vmem:[#allocation8 + $0x58] sm:$0xff] }
  0x20   :  { %115 = vmatpush.msra.mxu0 %v98_v10  ;;  %v181_v38 = vld [vmem:[#allocation8 + $0x50] sm:$0xff]  ;;  %v180_v39 = vld [vmem:[#allocation8 + $0x48] sm:$0xff]  ;;  %v179_v40 = vld [vmem:[#allocation8 + $0x40] sm:$0xff] }
  0x21   :  { %156 = vmatpush.msra.mxu1 %v139_v15  ;;  %192 = vmatpush.msra.mxu2 %v185_v34  ;;  %v178_v41 = vld [vmem:[#allocation8 + $0x38] sm:$0xff]  ;;  %v177_v42 = vld [vmem:[#allocation8 + $0x30] sm:$0xff]  ;;  %v176_v43 = vld [vmem:[#allocation8 + $0x28] sm:$0xff] }
  0x22   :  { %116 = vmatpush.msra.mxu0 %v97_v12  ;;  %v175_v44 = vld [vmem:[#allocation8 + $0x20] sm:$0xff]  ;;  %v174_v45 = vld [vmem:[#allocation8 + $0x18] sm:$0xff]  ;;  %v173_v50 = vld [vmem:[#allocation8 + $0x10] sm:$0xff] }
  0x23   :  { %157 = vmatpush.msra.mxu1 %v138_v17  ;;  %193 = vmatpush.msra.mxu2 %v184_v35  ;;  %v238_v46 = vld [vmem:[%s444_s4] ss:$0 sm:$0xff]  ;;  %v172_v51 = vld [vmem:[#allocation8 + $0x8] sm:$0xff]  ;;  %v171_v52 = vld [vmem:[#allocation8] sm:$0xff] }
  0x24   :  { %117 = vmatpush.msra.mxu0 %v96_v14  ;;  %v239_v53 = vld [vmem:[%s445_s5] ss:$0 sm:$0xff] }
  0x25   :  { %158 = vmatpush.msra.mxu1 %v137_v19  ;;  %194 = vmatpush.msra.mxu2 %v183_v36  ;;  %v240_v57 = vld [vmem:[%s446_s6] ss:$0 sm:$0xff] }
  0x26   :  { %118 = vmatpush.msra.mxu0 %v95_v16 }
  0x27   :  { %159 = vmatpush.msra.mxu1 %v136_v21  ;;  %195 = vmatpush.msra.mxu2 %v182_v37 }
  0x28   :  { %119 = vmatpush.msra.mxu0 %v94_v18 }
  0x29   :  { %160 = vmatpush.msra.mxu1 %v135_v23  ;;  %196 = vmatpush.msra.mxu2 %v181_v38 }
  0x2a   :  { %120 = vmatpush.msra.mxu0 %v93_v20 }
  0x2b   :  { %161 = vmatpush.msra.mxu1 %v134_v25  ;;  %197 = vmatpush.msra.mxu2 %v180_v39 }
  0x2c   :  { %121 = vmatpush.msra.mxu0 %v92_v22 }
  0x2d   :  { %162 = vmatpush.msra.mxu1 %v133_v27  ;;  %198 = vmatpush.msra.mxu2 %v179_v40 }
  0x2e   :  { %122 = vmatpush.msra.mxu0 %v91_v24 }
  0x2f   :  { %163 = vmatpush.msra.mxu1 %v132_v30  ;;  %199 = vmatpush.msra.mxu2 %v178_v41 }
  0x30   :  { %123 = vmatpush.msra.mxu0 %v90_v26 }
  0x31   :  { %164 = vmatpush.msra.mxu1 %v131_v31  ;;  %200 = vmatpush.msra.mxu2 %v177_v42 }
  0x32   :  { %124 = vmatpush.msra.mxu0 %v89_v28 }
  0x33   :  { %125 = vmatmul.f32.vlgmr.msra.gmra.mxu0 %v88_v29  ;;  %165 = vmatpush.msra.mxu1 %v130_v32 }
  0x34   :  { %201 = vmatpush.msra.mxu2 %v176_v43 }
  0x36   :  { %202 = vmatpush.msra.mxu2 %v175_v44 }
  0x38   :  { %203 = vmatpush.msra.mxu2 %v174_v45 }
  0x3a   :  { %204 = vmatpush.msra.mxu2 %v173_v50 }
  0x3c   :  { %205 = vmatpush.msra.mxu2 %v172_v51 }
  0x3e   :  { %206 = vmatpush.msra.mxu2 %v171_v52 }
  0xb0   :  { %v126_v47 = vpop.f32.mrf.mxu0 }
  0xb1   :  { %v127_v48 = vadd.f32 %v238_v46, %v126_v47 }
  0xb3   :  { %v129_v49 = vmax.f32 %v127_v48, 0.0 }
  0xb5   :  { %166 = vmatmul.f32.vlgmr.msra.gmra.mxu1 %v129_v49 }
 0x132   :  { %v167_v54 = vpop.f32.mrf.mxu1 }
 0x133   :  { %v168_v55 = vadd.f32 %v239_v53, %v167_v54 }
 0x135   :  { %v170_v56 = vmax.f32 %v168_v55, 0.0 }
 0x137   :  { %207 = vmatmul.f32.vlgmr.msra.gmra.mxu2 %v170_v56 }
 0x1ba   :  { %v208_v58 = vpop.f32.mrf.mxu2 }
 0x1bb   :  { %v209_v59 = vadd.f32 %v240_v57, %v208_v58 }
 0x1bd   :  { %211 = vst [vmem:[#allocation10] sm:$0xff] %v209_v59 }
 0x1be   :  { %222 = dma.vmem_to_hbm [thread:$0]  %s218_s25, 128, %s220_s28, [#allocation4]  }
 0x1bf   :  { %367 = dma.done.wait [#allocation4], 128  }
 0x1c0   :  { %368 = vsyncadd [#allocation4], 4294967168 }
 0x1c1   :  { %227 = vsyncpa [#allocation3], 1 }
 0x1c2   :  { %228 = vsyncpa [#allocation6], 1 }
 0x1c3   :  { %229 = vsyncpa [#allocation9], 1 }
 0x1c4   :  { %230 = vsyncpa [#allocation4], 1 }

// kernel: tpu_custom_call.1
= control target key start
LH: loop header
LB: loop body
LE: loop exit
PB: predicated region body
PF: predicated region fallthrough
CT: control target
= control target key end

     0   :  { %12 = vsyncpa [#allocation3], 0  ;;  %s440_s0 = inlined_call_operand.hbm [shape: f32[8,128], index: 0, kind: input, shape index: {}]   ;;  %s441_s1 = inlined_call_operand.hbm [shape: f32[128,128], index: 1, kind: input, shape index: {}]   ;;  %s442_s2 = inlined_call_operand.hbm [shape: f32[128,128], index: 2, kind: input, shape index: {}]   ;;  %s443_s3 = inlined_call_operand.hbm [shape: f32[128,128], index: 3, kind: input, shape index: {}]   ;;  %s444_s4 = inlined_call_operand.vmem [shape: f32[1,128], index: 4, kind: input, shape index: {}]   ;;  %s445_s5 = inlined_call_operand.vmem [shape: f32[1,128], index: 5, kind: input, shape index: {}]   ;;  %s446_s6 = inlined_call_operand.vmem [shape: f32[1,128], index: 6, kind: input, shape index: {}]   ;;  %s447_s7 = inlined_call_operand.hbm [shape: f32[8,128], index: 7, kind: output, shape index: {}]  }
   0x1   :  { %13 = vsyncpa [#allocation6], 0 }
   0x2   :  { %14 = vsyncpa [#allocation9], 0  ;;  %s31_s26 = sshll.u32 %s441_s1, 4  ;;  %s32_s26 = int_to_ptr.hbm [resolvable:$true] %s31_s26 }
   0x3   :  { %15 = vsyncpa [#allocation4], 0  ;;  %s369_s27 = smov [#allocation5]   ;;  %s21_s8 = sshll.u32 %s440_s0, 4  ;;  %s22_s8 = int_to_ptr.hbm [resolvable:$true] %s21_s8 }
   0x4   :  { %s33_s28 = sshll.u32 %s369_s27, 4  ;;  %s370_s9 = smov 128   ;;  %s34_s28 = int_to_ptr.vmem [resolvable:$true] %s33_s28 }
   0x5   :  { %s371_s10 = smov 8   ;;  %s372_s11 = smov [#allocation2]  }
   0x6   :  { %39 = dma.hbm_to_vmem [thread:$0]  %s32_s26, 2048, %s34_s28, [#allocation6], %s370_s9, %s370_s9, %s371_s10  }
   0x7   :  { %s23_s12 = sshll.u32 %s372_s11, 4  ;;  %s44_s15 = sshll.u32 %s442_s2, 4  ;;  %s24_s12 = int_to_ptr.vmem [resolvable:$true] %s23_s12  ;;  %s45_s15 = int_to_ptr.hbm [resolvable:$true] %s44_s15 }
   0x8   :  { %26 = dma.hbm_to_vmem [thread:$0]  %s22_s8, 128, %s24_s12, [#allocation3]  }
   0x9   :  { %s57_s17 = sshll.u32 %s443_s3, 4  ;;  %s373_s18 = smov [#allocation7]   ;;  %s58_s17 = int_to_ptr.hbm [resolvable:$true] %s57_s17 }
   0xa   :  { %s46_s19 = sshll.u32 %s373_s18, 4  ;;  %s374_s0 = smov [#allocation8]   ;;  %s47_s19 = int_to_ptr.vmem [resolvable:$true] %s46_s19 }
   0xb   :  { %52 = dma.hbm_to_vmem [thread:$0]  %s45_s15, 2048, %s47_s19, [#allocation6], %s370_s9, %s370_s9, %s371_s10  }
   0xc   :  { %s59_s20 = sshll.u32 %s374_s0, 4  ;;  %s60_s20 = int_to_ptr.vmem [resolvable:$true] %s59_s20 }
   0xd   :  { %65 = dma.hbm_to_vmem [thread:$0]  %s58_s17, 2048, %s60_s20, [#allocation9], %s370_s9, %s370_s9, %s371_s10  }
   0xe   :  { %361 = dma.done.wait [#allocation3], 128  }
   0xf   :  { %362 = vsyncadd [#allocation3], 4294967168 }
  0x10   :  { %363 = dma.done.wait [#allocation6], 4096  }
  0x11   :  { %364 = vsyncadd [#allocation6], 4294963200 }
  0x12   :  { %365 = dma.done.wait [#allocation9], 2048  }
  0x13   :  { %366 = vsyncadd [#allocation9], 4294965248  ;;  %v104_v0 = vld [vmem:[#allocation5 + $0x78] sm:$0xff]  ;;  %v103_v1 = vld [vmem:[#allocation5 + $0x70] sm:$0xff]  ;;  %s375_s24 = smov [#allocation10]   ;;  %s219_s28 = sshll.u32 %s447_s7, 4  ;;  %s220_s28 = int_to_ptr.hbm [resolvable:$true] %s219_s28 }
  0x14   :  { %109 = vmatpush.msra.mxu0 %v104_v0  ;;  %v102_v2 = vld [vmem:[#allocation5 + $0x68] sm:$0xff]  ;;  %v101_v3 = vld [vmem:[#allocation5 + $0x60] sm:$0xff]  ;;  %v145_v4 = vld [vmem:[#allocation7 + $0x78] sm:$0xff]  ;;  %s217_s25 = sshll.u32 %s375_s24, 4  ;;  %s218_s25 = int_to_ptr.vmem [resolvable:$true] %s217_s25 }
  0x15   :  { %v100_v5 = vld [vmem:[#allocation5 + $0x58] sm:$0xff]  ;;  %150 = vmatpush.msra.mxu1 %v145_v4  ;;  %v144_v6 = vld [vmem:[#allocation7 + $0x70] sm:$0xff]  ;;  %v143_v7 = vld [vmem:[#allocation7 + $0x68] sm:$0xff] }
  0x16   :  { %110 = vmatpush.msra.mxu0 %v103_v1  ;;  %v99_v8 = vld [vmem:[#allocation5 + $0x50] sm:$0xff]  ;;  %v142_v9 = vld [vmem:[#allocation7 + $0x60] sm:$0xff]  ;;  %v98_v10 = vld [vmem:[#allocation5 + $0x48] sm:$0xff] }
  0x17   :  { %151 = vmatpush.msra.mxu1 %v144_v6  ;;  %v141_v11 = vld [vmem:[#allocation7 + $0x58] sm:$0xff]  ;;  %v97_v12 = vld [vmem:[#allocation5 + $0x40] sm:$0xff]  ;;  %v140_v13 = vld [vmem:[#allocation7 + $0x50] sm:$0xff] }
  0x18   :  { %111 = vmatpush.msra.mxu0 %v102_v2  ;;  %v96_v14 = vld [vmem:[#allocation5 + $0x38] sm:$0xff]  ;;  %v139_v15 = vld [vmem:[#allocation7 + $0x48] sm:$0xff]  ;;  %v95_v16 = vld [vmem:[#allocation5 + $0x30] sm:$0xff] }
  0x19   :  { %152 = vmatpush.msra.mxu1 %v143_v7  ;;  %v138_v17 = vld [vmem:[#allocation7 + $0x40] sm:$0xff]  ;;  %v94_v18 = vld [vmem:[#allocation5 + $0x28] sm:$0xff]  ;;  %v137_v19 = vld [vmem:[#allocation7 + $0x38] sm:$0xff] }
  0x1a   :  { %112 = vmatpush.msra.mxu0 %v101_v3  ;;  %v93_v20 = vld [vmem:[#allocation5 + $0x20] sm:$0xff]  ;;  %v136_v21 = vld [vmem:[#allocation7 + $0x30] sm:$0xff]  ;;  %v92_v22 = vld [vmem:[#allocation5 + $0x18] sm:$0xff] }
  0x1b   :  { %153 = vmatpush.msra.mxu1 %v142_v9  ;;  %v135_v23 = vld [vmem:[#allocation7 + $0x28] sm:$0xff]  ;;  %v91_v24 = vld [vmem:[#allocation5 + $0x10] sm:$0xff]  ;;  %v134_v25 = vld [vmem:[#allocation7 + $0x20] sm:$0xff] }
  0x1c   :  { %113 = vmatpush.msra.mxu0 %v100_v5  ;;  %v90_v26 = vld [vmem:[#allocation5 + $0x8] sm:$0xff]  ;;  %v133_v27 = vld [vmem:[#allocation7 + $0x18] sm:$0xff]  ;;  %v89_v28 = vld [vmem:[#allocation5] sm:$0xff] }
  0x1d   :  { %154 = vmatpush.msra.mxu1 %v141_v11  ;;  %v88_v29 = vld [vmem:[#allocation2] sm:$0xff]  ;;  %v132_v30 = vld [vmem:[#allocation7 + $0x10] sm:$0xff]  ;;  %v131_v31 = vld [vmem:[#allocation7 + $0x8] sm:$0xff] }
  0x1e   :  { %114 = vmatpush.msra.mxu0 %v99_v8  ;;  %v130_v32 = vld [vmem:[#allocation7] sm:$0xff]  ;;  %v186_v33 = vld [vmem:[#allocation8 + $0x78] sm:$0xff]  ;;  %v185_v34 = vld [vmem:[#allocation8 + $0x70] sm:$0xff] }
  0x1f   :  { %155 = vmatpush.msra.mxu1 %v140_v13  ;;  %191 = vmatpush.msra.mxu2 %v186_v33  ;;  %v184_v35 = vld [vmem:[#allocation8 + $0x68] sm:$0xff]  ;;  %v183_v36 = vld [vmem:[#allocation8 + $0x60] sm:$0xff]  ;;  %v182_v37 = vld [vmem:[#allocation8 + $0x58] sm:$0xff] }
  0x20   :  { %115 = vmatpush.msra.mxu0 %v98_v10  ;;  %v181_v38 = vld [vmem:[#allocation8 + $0x50] sm:$0xff]  ;;  %v180_v39 = vld [vmem:[#allocation8 + $0x48] sm:$0xff]  ;;  %v179_v40 = vld [vmem:[#allocation8 + $0x40] sm:$0xff] }
  0x21   :  { %156 = vmatpush.msra.mxu1 %v139_v15  ;;  %192 = vmatpush.msra.mxu2 %v185_v34  ;;  %v178_v41 = vld [vmem:[#allocation8 + $0x38] sm:$0xff]  ;;  %v177_v42 = vld [vmem:[#allocation8 + $0x30] sm:$0xff]  ;;  %v176_v43 = vld [vmem:[#allocation8 + $0x28] sm:$0xff] }
  0x22   :  { %116 = vmatpush.msra.mxu0 %v97_v12  ;;  %v175_v44 = vld [vmem:[#allocation8 + $0x20] sm:$0xff]  ;;  %v174_v45 = vld [vmem:[#allocation8 + $0x18] sm:$0xff]  ;;  %v173_v50 = vld [vmem:[#allocation8 + $0x10] sm:$0xff] }
  0x23   :  { %157 = vmatpush.msra.mxu1 %v138_v17  ;;  %193 = vmatpush.msra.mxu2 %v184_v35  ;;  %v238_v46 = vld [vmem:[%s444_s4] ss:$0 sm:$0xff]  ;;  %v172_v51 = vld [vmem:[#allocation8 + $0x8] sm:$0xff]  ;;  %v171_v52 = vld [vmem:[#allocation8] sm:$0xff] }
  0x24   :  { %117 = vmatpush.msra.mxu0 %v96_v14  ;;  %v239_v53 = vld [vmem:[%s445_s5] ss:$0 sm:$0xff] }
  0x25   :  { %158 = vmatpush.msra.mxu1 %v137_v19  ;;  %194 = vmatpush.msra.mxu2 %v183_v36  ;;  %v240_v57 = vld [vmem:[%s446_s6] ss:$0 sm:$0xff] }
  0x26   :  { %118 = vmatpush.msra.mxu0 %v95_v16 }
  0x27   :  { %159 = vmatpush.msra.mxu1 %v136_v21  ;;  %195 = vmatpush.msra.mxu2 %v182_v37 }
  0x28   :  { %119 = vmatpush.msra.mxu0 %v94_v18 }
  0x29   :  { %160 = vmatpush.msra.mxu1 %v135_v23  ;;  %196 = vmatpush.msra.mxu2 %v181_v38 }
  0x2a   :  { %120 = vmatpush.msra.mxu0 %v93_v20 }
  0x2b   :  { %161 = vmatpush.msra.mxu1 %v134_v25  ;;  %197 = vmatpush.msra.mxu2 %v180_v39 }
  0x2c   :  { %121 = vmatpush.msra.mxu0 %v92_v22 }
  0x2d   :  { %162 = vmatpush.msra.mxu1 %v133_v27  ;;  %198 = vmatpush.msra.mxu2 %v179_v40 }
  0x2e   :  { %122 = vmatpush.msra.mxu0 %v91_v24 }
  0x2f   :  { %163 = vmatpush.msra.mxu1 %v132_v30  ;;  %199 = vmatpush.msra.mxu2 %v178_v41 }
  0x30   :  { %123 = vmatpush.msra.mxu0 %v90_v26 }
  0x31   :  { %164 = vmatpush.msra.mxu1 %v131_v31  ;;  %200 = vmatpush.msra.mxu2 %v177_v42 }
  0x32   :  { %124 = vmatpush.msra.mxu0 %v89_v28 }
  0x33   :  { %125 = vmatmul.f32.vlgmr.msra.gmra.mxu0 %v88_v29  ;;  %165 = vmatpush.msra.mxu1 %v130_v32 }
  0x34   :  { %201 = vmatpush.msra.mxu2 %v176_v43 }
  0x36   :  { %202 = vmatpush.msra.mxu2 %v175_v44 }
  0x38   :  { %203 = vmatpush.msra.mxu2 %v174_v45 }
  0x3a   :  { %204 = vmatpush.msra.mxu2 %v173_v50 }
  0x3c   :  { %205 = vmatpush.msra.mxu2 %v172_v51 }
  0x3e   :  { %206 = vmatpush.msra.mxu2 %v171_v52 }
  0xb0   :  { %v126_v47 = vpop.f32.mrf.mxu0 }
  0xb1   :  { %v127_v48 = vadd.f32 %v238_v46, %v126_v47 }
  0xb3   :  { %v129_v49 = vmax.f32 %v127_v48, 0.0 }
  0xb5   :  { %166 = vmatmul.f32.vlgmr.msra.gmra.mxu1 %v129_v49 }
 0x132   :  { %v167_v54 = vpop.f32.mrf.mxu1 }
 0x133   :  { %v168_v55 = vadd.f32 %v239_v53, %v167_v54 }
 0x135   :  { %v170_v56 = vmax.f32 %v168_v55, 0.0 }
 0x137   :  { %207 = vmatmul.f32.vlgmr.msra.gmra.mxu2 %v170_v56 }
 0x1ba   :  { %v208_v58 = vpop.f32.mrf.mxu2 }
 0x1bb   :  { %v209_v59 = vadd.f32 %v240_v57, %v208_v58 }
 0x1bd   :  { %211 = vst [vmem:[#allocation10] sm:$0xff] %v209_v59 }
 0x1be   :  { %222 = dma.vmem_to_hbm [thread:$0]  %s218_s25, 128, %s220_s28, [#allocation4]  }
 0x1bf   :  { %367 = dma.done.wait [#allocation4], 128  }
 0x1c0   :  { %368 = vsyncadd [#allocation4], 4294967168 }
 0x1c1   :  { %227 = vsyncpa [#allocation3], 1 }
 0x1c2   :  { %228 = vsyncpa [#allocation6], 1 }
 0x1c3   :  { %229 = vsyncpa [#allocation9], 1 }
 0x1c4   :  { %230 = vsyncpa [#allocation4], 1 }

</bundles_post_ra>
